<compile_context>
chip_gen: v7x
topology: tpu7x:2x2x1
jax: 0.10.0
libtpu: 0.0.40
codegen_flags: <defaults>
</compile_context>

<pallas_src>
import math

import jax
import jax.numpy as jnp
from jax.experimental import pallas as pl
from jax.experimental.pallas import tpu as pltpu


def _make_cluster_loss1_kernel(B, D, P):
    G = P * D
    inv_b = 1.0 / float(B)
    scale = 1.0 / (float(B) * float(D) * float(D))
    dm2 = float(D) - 2.0

    def kernel(x_ref, lab_ref, out_ref, center_acc, xsum_acc, xsq_acc):
        # x_ref:      (tbp, G, tf) VMEM -- G = P*D packed rows, F tile on lanes
        # lab_ref:    (tbp, G, 1)  VMEM -- labels, lane-broadcastable
        # out_ref:    (1, 1)       SMEM -- per-F-tile partial loss
        # *_acc:      (G, tf)      VMEM scratch accumulators (f32)
        bt = pl.program_id(1)
        nbt = pl.num_programs(1)

        x = x_ref[...].astype(jnp.float32)
        lab = lab_ref[...].astype(jnp.float32)

        @pl.when(bt == 0)
        def _init():
            center_acc[...] = jnp.zeros_like(center_acc)
            xsum_acc[...] = jnp.zeros_like(xsum_acc)
            xsq_acc[...] = jnp.zeros_like(xsq_acc)

        # Reduce the whole batch block at once (dense VPU adds over axis 0).
        center_acc[...] += jnp.sum(x * lab, axis=0)
        xsum_acc[...] += jnp.sum(x, axis=0)
        xsq_acc[...] += jnp.sum(x * x, axis=0)

        @pl.when(bt == nbt - 1)
        def _finalize():
            cg = center_acc[...]                      # (G, tf), per packed group
            xg = xsum_acc[...]
            center = cg[0:D, :]
            xsum = xg[0:D, :]
            for g in range(1, P):                     # merge packed groups -> (D, tf)
                center = center + cg[g * D:(g + 1) * D, :]
                xsum = xsum + xg[g * D:(g + 1) * D, :]
            center = center * inv_b                   # center[d, f]

            xsq_tot = jnp.sum(xsq_acc[...])                  # sum_{b,d,f in tile} x^2
            csq = jnp.sum(center * center)                   # sum_{d,f} c^2
            tr = jnp.sum(center * xsum)                      # sum_{d,f} c * Xsum
            sc = jnp.sum(center, axis=0, keepdims=True)      # (1, tf): Sc[f]
            sx = jnp.sum(xsum, axis=0, keepdims=True)        # (1, tf): SxSum[f]
            cross = jnp.sum(sc * sx)
            partial = (dm2 * xsq_tot + float(B) * dm2 * csq
                       - 2.0 * cross + 4.0 * tr)
            out_ref[0, 0] = partial * scale

    return kernel


def cluster_loss1(stack_outputs, latent_domain_label, alpha=1.0):
    """Pallas implementation of ClusterLoss1.forward (returns a scalar)."""
    # TODO(synk): `alpha` only influences dead code in the reference forward
    # (the pro_belong / log branch whose result is overwritten), so it is
    # accepted but unused here.
    del alpha
    B, F, D = stack_outputs.shape

    # Sublane packing: fold `p` batch elements into the sublane axis so the
    # (p*D)-row tiles are 8-sublane dense.  The reshape after the transpose is
    # free (pure metadata).
    p = 8 // math.gcd(D, 8)
    if B % p != 0:
        p = 1
    Bp, G = B // p, p * D

    # Lane-dense layout: F (large) on the lane axis, (batch-pairs x D) on
    # sublanes.  allow_input_fusion lets XLA fuse this transpose into the
    # Pallas input DMA instead of materializing an extra HBM pass.
    x_l = jnp.transpose(stack_outputs, (0, 2, 1)).reshape(Bp, G, F)
    lab_l = jnp.reshape(latent_domain_label, (Bp, G, 1))

    # F tile: prefer large multiples of 128 (lane width); fall back to full F.
    # TODO(synk): pad F with zeros to a multiple of 128 for large odd F.
    tf = F
    if F % 128 == 0:
        for cand in (2048, 1024, 512, 256, 128):
            if F % cand == 0:
                tf = cand
                break
    nft = F // tf

    # Batch tile: largest divisor of Bp keeping the x block under ~4 MiB
    # (double-buffered inputs + accumulators stay well under 16 MiB VMEM).
    itemsize = jnp.dtype(stack_outputs.dtype).itemsize
    row_bytes = G * tf * itemsize
    cap = max(1, (4 * 1024 * 1024) // row_bytes)
    tbp = 1
    for c in range(min(Bp, cap), 0, -1):
        if Bp % c == 0:
            tbp = c
            break
    nbt = Bp // tbp

    kernel = _make_cluster_loss1_kernel(B, D, p)

    partials = pl.pallas_call(
        kernel,
        out_shape=jax.ShapeDtypeStruct((nft, 1), jnp.float32),
        grid=(nft, nbt),  # batch-tile innermost = reduction axis
        in_specs=[
            pl.BlockSpec((tbp, G, tf), lambda ft, bt: (bt, 0, ft)),
            pl.BlockSpec((tbp, G, 1), lambda ft, bt: (bt, 0, 0)),
        ],
        out_specs=pl.BlockSpec((1, 1), lambda ft, bt: (ft, 0),
                               memory_space=pltpu.MemorySpace.SMEM),
        scratch_shapes=[
            pltpu.VMEM((G, tf), jnp.float32),   # sum_b x*lab (center) accumulator
            pltpu.VMEM((G, tf), jnp.float32),   # sum_b x accumulator
            pltpu.VMEM((G, tf), jnp.float32),   # sum_b x^2 accumulator
        ],
        compiler_params=pltpu.CompilerParams(
            # F-tile axis is parallel (per-ft partial outputs, no shared
            # accumulator) so it shards across v7x's two TensorCores; the
            # batch-tile axis feeds the accumulators -> arbitrary.
            dimension_semantics=("parallel", "arbitrary"),
            allow_input_fusion=[True, False],
            vmem_limit_bytes=32 * 1024 * 1024,
        ),
    )(x_l, lab_l)
    return jnp.sum(partials)


def _cluster_loss1_ref(stack_outputs, latent_domain_label):
    """Pure-JAX reference mirroring the PyTorch math (direct formulation)."""
    x = stack_outputs.astype(jnp.float32)
    lab = latent_domain_label.astype(jnp.float32)
    B, F, D = x.shape
    center = jnp.mean(x * lab[:, None, :], axis=0)                 # (F, D)
    diff = x[:, :, :, None] - center[None, :, None, :]             # (B, F, D, D)
    clm = jnp.sum(diff * diff, axis=1)                             # (B, D, D)
    sig = jnp.ones((D, D), jnp.float32) - 2.0 * jnp.eye(D, dtype=jnp.float32)
    return jnp.mean(clm * sig[None, :, :])


if __name__ == "__main__":
    # Shapes implied by the forward: (batch, features, domains)
    B, F, D = 8, 256, 4
    key = jax.random.PRNGKey(0)
    k1, k2 = jax.random.split(key)
    stack_outputs = jax.random.normal(k1, (B, F, D), dtype=jnp.float32)
    # latent domain label: soft assignment per batch element (rows sum to 1)
    latent_domain_label = jax.nn.softmax(
        jax.random.normal(k2, (B, D), dtype=jnp.float32), axis=-1
    )

    loss_fn = jax.jit(cluster_loss1)
    loss = loss_fn(stack_outputs, latent_domain_label)
    loss = jax.block_until_ready(loss)

    ref = _cluster_loss1_ref(stack_outputs, latent_domain_label)
    # Slightly relaxed tolerance: the kernel uses the algebraically folded
    # (x^2 - 2xc + c^2) form with f32 accumulation.
    assert jnp.allclose(loss, ref, rtol=1e-4, atol=1e-3), (loss, ref)

    print("KERNEL_OK")
</pallas_src>

<mosaic_0001>
module attributes {stable_mosaic.version = 11 : i64} {
  func.func @kernel(%arg0: i32, %arg1: i32, %arg2: memref<4x8x256xf32, #tpu.memory_space<vmem>>, %arg3: memref<4x8x1xf32, #tpu.memory_space<vmem>>, %arg4: memref<1x1xf32, #tpu.memory_space<smem>>, %arg5: memref<8x256xf32, #tpu.memory_space<vmem>>, %arg6: memref<8x256xf32, #tpu.memory_space<vmem>>, %arg7: memref<8x256xf32, #tpu.memory_space<vmem>>) attributes {dimension_semantics = [#tpu.dimension_semantics<parallel>, #tpu.dimension_semantics<arbitrary>], iteration_bounds = array<i64: 1, 1>, scalar_prefetch = 0 : i64, scratch_operands = 3 : i64, tpu.core_type = #tpu.core_type<tc>, window_params = [{transform_indices = @transform_0, window_bounds = array<i64: 4, 8, 256>}, {transform_indices = @transform_1, window_bounds = array<i64: 4, 8, 1>}, {transform_indices = @transform_2, window_bounds = array<i64: 1, 1>}]} {
    %c0 = arith.constant 0 : index
    %c0_0 = arith.constant 0 : index
    %c0_1 = arith.constant 0 : index
    %0 = vector.load %arg2[%c0, %c0_0, %c0_1] : memref<4x8x256xf32, #tpu.memory_space<vmem>>, vector<4x8x256xf32>
    %c0_2 = arith.constant 0 : index
    %c0_3 = arith.constant 0 : index
    %c0_4 = arith.constant 0 : index
    %1 = vector.load %arg3[%c0_2, %c0_3, %c0_4] : memref<4x8x1xf32, #tpu.memory_space<vmem>>, vector<4x8x1xf32>
    %c0_i32 = arith.constant 0 : i32
    %2 = arith.cmpi eq, %arg1, %c0_i32 : i32
    %3 = arith.extui %2 : i1 to i32
    %c0_i32_5 = arith.constant 0 : i32
    %4 = arith.cmpi ne, %3, %c0_i32_5 : i32
    scf.if %4 {
      %cst_22 = arith.constant 0.000000e+00 : f32
      %23 = vector.broadcast %cst_22 : f32 to vector<8x256xf32>
      %c0_23 = arith.constant 0 : index
      %c0_24 = arith.constant 0 : index
      %24 = vector.load %arg5[%c0_23, %c0_24] : memref<8x256xf32, #tpu.memory_space<vmem>>, vector<8x256xf32>
      tpu.vector_store %arg5[%c0_23, %c0_24], %23 {strides = array<i32>} : memref<8x256xf32, #tpu.memory_space<vmem>>, vector<8x256xf32>,
      %cst_25 = arith.constant 0.000000e+00 : f32
      %25 = vector.broadcast %cst_25 : f32 to vector<8x256xf32>
      %c0_26 = arith.constant 0 : index
      %c0_27 = arith.constant 0 : index
      %26 = vector.load %arg6[%c0_26, %c0_27] : memref<8x256xf32, #tpu.memory_space<vmem>>, vector<8x256xf32>
      tpu.vector_store %arg6[%c0_26, %c0_27], %25 {strides = array<i32>} : memref<8x256xf32, #tpu.memory_space<vmem>>, vector<8x256xf32>,
      %cst_28 = arith.constant 0.000000e+00 : f32
      %27 = vector.broadcast %cst_28 : f32 to vector<8x256xf32>
      %c0_29 = arith.constant 0 : index
      %c0_30 = arith.constant 0 : index
      %28 = vector.load %arg7[%c0_29, %c0_30] : memref<8x256xf32, #tpu.memory_space<vmem>>, vector<8x256xf32>
      tpu.vector_store %arg7[%c0_29, %c0_30], %27 {strides = array<i32>} : memref<8x256xf32, #tpu.memory_space<vmem>>, vector<8x256xf32>,
    } else {
    }
    %c0_6 = arith.constant 0 : index
    %c0_7 = arith.constant 0 : index
    %5 = vector.load %arg5[%c0_6, %c0_7] : memref<8x256xf32, #tpu.memory_space<vmem>>, vector<8x256xf32>
    %6 = vector.broadcast %1 : vector<4x8x1xf32> to vector<4x8x256xf32>
    %7 = arith.mulf %0, %6 : vector<4x8x256xf32>
    %cst = arith.constant dense<0.000000e+00> : vector<8x256xf32>
    %8 = vector.multi_reduction <add>, %7, %cst [0] : vector<4x8x256xf32> to vector<8x256xf32>
    %9 = arith.addf %5, %8 : vector<8x256xf32>
    %c0_8 = arith.constant 0 : index
    %c0_9 = arith.constant 0 : index
    %10 = vector.load %arg5[%c0_8, %c0_9] : memref<8x256xf32, #tpu.memory_space<vmem>>, vector<8x256xf32>
    tpu.vector_store %arg5[%c0_8, %c0_9], %9 {strides = array<i32>} : memref<8x256xf32, #tpu.memory_space<vmem>>, vector<8x256xf32>,
    %c0_10 = arith.constant 0 : index
    %c0_11 = arith.constant 0 : index
    %11 = vector.load %arg6[%c0_10, %c0_11] : memref<8x256xf32, #tpu.memory_space<vmem>>, vector<8x256xf32>
    %cst_12 = arith.constant dense<0.000000e+00> : vector<8x256xf32>
    %12 = vector.multi_reduction <add>, %0, %cst_12 [0] : vector<4x8x256xf32> to vector<8x256xf32>
    %13 = arith.addf %11, %12 : vector<8x256xf32>
    %c0_13 = arith.constant 0 : index
    %c0_14 = arith.constant 0 : index
    %14 = vector.load %arg6[%c0_13, %c0_14] : memref<8x256xf32, #tpu.memory_space<vmem>>, vector<8x256xf32>
    tpu.vector_store %arg6[%c0_13, %c0_14], %13 {strides = array<i32>} : memref<8x256xf32, #tpu.memory_space<vmem>>, vector<8x256xf32>,
    %c0_15 = arith.constant 0 : index
    %c0_16 = arith.constant 0 : index
    %15 = vector.load %arg7[%c0_15, %c0_16] : memref<8x256xf32, #tpu.memory_space<vmem>>, vector<8x256xf32>
    %16 = arith.mulf %0, %0 : vector<4x8x256xf32>
    %cst_17 = arith.constant dense<0.000000e+00> : vector<8x256xf32>
    %17 = vector.multi_reduction <add>, %16, %cst_17 [0] : vector<4x8x256xf32> to vector<8x256xf32>
    %18 = arith.addf %15, %17 : vector<8x256xf32>
    %c0_18 = arith.constant 0 : index
    %c0_19 = arith.constant 0 : index
    %19 = vector.load %arg7[%c0_18, %c0_19] : memref<8x256xf32, #tpu.memory_space<vmem>>, vector<8x256xf32>
    tpu.vector_store %arg7[%c0_18, %c0_19], %18 {strides = array<i32>} : memref<8x256xf32, #tpu.memory_space<vmem>>, vector<8x256xf32>,
    %c0_i32_20 = arith.constant 0 : i32
    %20 = arith.cmpi eq, %arg1, %c0_i32_20 : i32
    %21 = arith.extui %20 : i1 to i32
    %c0_i32_21 = arith.constant 0 : i32
    %22 = arith.cmpi ne, %21, %c0_i32_21 : i32
    scf.if %22 {
      %c0_22 = arith.constant 0 : index
      %c0_23 = arith.constant 0 : index
      %23 = vector.load %arg5[%c0_22, %c0_23] : memref<8x256xf32, #tpu.memory_space<vmem>>, vector<8x256xf32>
      %c0_24 = arith.constant 0 : index
      %c0_25 = arith.constant 0 : index
      %24 = vector.load %arg6[%c0_24, %c0_25] : memref<8x256xf32, #tpu.memory_space<vmem>>, vector<8x256xf32>
      %25 = vector.extract_strided_slice %23 {offsets = [0, 0], sizes = [4, 256], strides = [1, 1]} : vector<8x256xf32> to vector<4x256xf32>
      %26 = vector.extract_strided_slice %24 {offsets = [0, 0], sizes = [4, 256], strides = [1, 1]} : vector<8x256xf32> to vector<4x256xf32>
      %27 = vector.extract_strided_slice %23 {offsets = [4, 0], sizes = [4, 256], strides = [1, 1]} : vector<8x256xf32> to vector<4x256xf32>
      %28 = arith.addf %25, %27 : vector<4x256xf32>
      %29 = vector.extract_strided_slice %24 {offsets = [4, 0], sizes = [4, 256], strides = [1, 1]} : vector<8x256xf32> to vector<4x256xf32>
      %30 = arith.addf %26, %29 : vector<4x256xf32>
      %cst_26 = arith.constant 1.250000e-01 : f32
      %31 = vector.broadcast %cst_26 : f32 to vector<4x256xf32>
      %32 = arith.mulf %28, %31 : vector<4x256xf32>
      %c0_27 = arith.constant 0 : index
      %c0_28 = arith.constant 0 : index
      %33 = vector.load %arg7[%c0_27, %c0_28] : memref<8x256xf32, #tpu.memory_space<vmem>>, vector<8x256xf32>
      %34 = vector.shape_cast %33 : vector<8x256xf32> to vector<1x8x256xf32>
      %cst_29 = arith.constant dense<0.000000e+00> : vector<1xf32>
      %35 = vector.multi_reduction <add>, %34, %cst_29 [1, 2] : vector<1x8x256xf32> to vector<1xf32>
      %36 = vector.shape_cast %35 : vector<1xf32> to vector<1x1x1xf32>
      %37 = vector.extract %36[0, 0, 0] : f32 from vector<1x1x1xf32>
      %38 = arith.mulf %32, %32 : vector<4x256xf32>
      %39 = vector.shape_cast %38 : vector<4x256xf32> to vector<1x4x256xf32>
      %cst_30 = arith.constant dense<0.000000e+00> : vector<1xf32>
      %40 = vector.multi_reduction <add>, %39, %cst_30 [1, 2] : vector<1x4x256xf32> to vector<1xf32>
      %41 = vector.shape_cast %40 : vector<1xf32> to vector<1x1x1xf32>
      %42 = vector.extract %41[0, 0, 0] : f32 from vector<1x1x1xf32>
      %43 = arith.mulf %32, %30 : vector<4x256xf32>
      %44 = vector.shape_cast %43 : vector<4x256xf32> to vector<1x4x256xf32>
      %cst_31 = arith.constant dense<0.000000e+00> : vector<1xf32>
      %45 = vector.multi_reduction <add>, %44, %cst_31 [1, 2] : vector<1x4x256xf32> to vector<1xf32>
      %46 = vector.shape_cast %45 : vector<1xf32> to vector<1x1x1xf32>
      %47 = vector.extract %46[0, 0, 0] : f32 from vector<1x1x1xf32>
      %cst_32 = arith.constant dense<0.000000e+00> : vector<256xf32>
      %48 = vector.multi_reduction <add>, %32, %cst_32 [0] : vector<4x256xf32> to vector<256xf32>
      %49 = vector.shape_cast %48 : vector<256xf32> to vector<1x256xf32>
      %cst_33 = arith.constant dense<0.000000e+00> : vector<256xf32>
      %50 = vector.multi_reduction <add>, %30, %cst_33 [0] : vector<4x256xf32> to vector<256xf32>
      %51 = vector.shape_cast %50 : vector<256xf32> to vector<1x256xf32>
      %52 = arith.mulf %49, %51 : vector<1x256xf32>
      %53 = vector.shape_cast %52 : vector<1x256xf32> to vector<1x1x256xf32>
      %cst_34 = arith.constant dense<0.000000e+00> : vector<1xf32>
      %54 = vector.multi_reduction <add>, %53, %cst_34 [1, 2] : vector<1x1x256xf32> to vector<1xf32>
      %55 = vector.shape_cast %54 : vector<1xf32> to vector<1x1x1xf32>
      %56 = vector.extract %55[0, 0, 0] : f32 from vector<1x1x1xf32>
      %cst_35 = arith.constant 2.000000e+00 : f32
      %57 = arith.mulf %cst_35, %37 : f32
      %cst_36 = arith.constant 1.600000e+01 : f32
      %58 = arith.mulf %cst_36, %42 : f32
      %59 = arith.addf %57, %58 : f32
      %cst_37 = arith.constant 2.000000e+00 : f32
      %60 = arith.mulf %cst_37, %56 : f32
      %61 = arith.subf %59, %60 : f32
      %cst_38 = arith.constant 4.000000e+00 : f32
      %62 = arith.mulf %cst_38, %47 : f32
      %63 = arith.addf %61, %62 : f32
      %cst_39 = arith.constant 7.812500e-03 : f32
      %64 = arith.mulf %63, %cst_39 : f32
      %c0_40 = arith.constant 0 : index
      %c0_41 = arith.constant 0 : index
      %65 = memref.load %arg4[%c0_40, %c0_41] : memref<1x1xf32, #tpu.memory_space<smem>>
      memref.store %64, %arg4[%c0_40, %c0_41] : memref<1x1xf32, #tpu.memory_space<smem>>
    } else {
    }
    return
  }
  func.func @transform_0(%arg0: i32, %arg1: i32) -> (i32, i32, i32) {
    %c0_i32 = arith.constant 0 : i32
    %c0_i32_0 = arith.constant 0 : i32
    return %arg1, %c0_i32, %arg0 : i32, i32, i32
  }
  func.func @transform_1(%arg0: i32, %arg1: i32) -> (i32, i32, i32) {
    %c0_i32 = arith.constant 0 : i32
    %c0_i32_0 = arith.constant 0 : i32
    %c0_i32_1 = arith.constant 0 : i32
    return %arg1, %c0_i32, %c0_i32_0 : i32, i32, i32
  }
  func.func @transform_2(%arg0: i32, %arg1: i32) -> (i32, i32) {
    %c0_i32 = arith.constant 0 : i32
    %c0_i32_0 = arith.constant 0 : i32
    return %arg0, %c0_i32 : i32, i32
  }
}

</mosaic_0001>

<bundles_post_ra>
// kernel: cluster_loss1.1
= control target key start
LH: loop header
LB: loop body
LE: loop exit
PB: predicated region body
PF: predicated region fallthrough
CT: control target
= control target key end

     0   :  { %v262_v2 = vmov 0   ;;  %s335_s0 = inlined_call_operand.vmem [shape: f32[4,8,256], index: 0, kind: input, shape index: {}]   ;;  %s336_s1 = inlined_call_operand.vmem [shape: f32[4,8,1], index: 1, kind: input, shape index: {}]   ;;  %s337_s2 = inlined_call_operand.hbm [shape: f32[1,1], index: 2, kind: output, shape index: {}]  }
   0x1   :  { %v22_v0 = vld [vmem:[%s336_s1 + $0x10] sm:$0xff]  ;;  %v20_v1 = vld [vmem:[%s336_s1] sm:$0xff]  ;;  %249 = vset.pattern.permute.xlu1 %v262_v2  ;;  %248 = vset.pattern.permute.xlu0 %v262_v2 }
   0x2   :  { %48 = vperm.xlu1 %249, %v22_v0   ;;  %38 = vperm.xlu0 %248, %v20_v1  }
   0x3   :  { %7 = vsyncpa [#allocation6], 0  ;;  %v23_v3 = vld [vmem:[%s336_s1 + $0x18] sm:$0xff]  ;;  %v21_v4 = vld [vmem:[%s336_s1 + $0x8] sm:$0xff]  ;;  %vm145_vm0 = vcmask 1043456   ;;  %vm202_vm1 = vcmask 1040384  }
   0x4   :  { %v12_v5 = vld [vmem:[%s335_s0] sm:$0xff]  ;;  %v13_v6 = vld [vmem:[%s335_s0 + $0x8] sm:$0xff]  ;;  %v14_v7 = vld [vmem:[%s335_s0 + $0x10] sm:$0xff]  ;;  %s250_s17 = scalar_lea.hbm %s337_s2, 16 }
   0x5   :  { %v15_v8 = vld [vmem:[%s335_s0 + $0x18] sm:$0xff]  ;;  %v88_v9 = vmul.f32 %v12_v5, %v12_v5  ;;  %v89_v10 = vmul.f32 %v13_v6, %v13_v6  ;;  %v90_v11 = vmul.f32 %v14_v7, %v14_v7  ;;  %v16_v13 = vld [vmem:[%s335_s0 + $0x20] sm:$0xff]  ;;  %v17_v14 = vld [vmem:[%s335_s0 + $0x28] sm:$0xff]  ;;  %v76_v28 = vadd.f32 %v14_v7, %v12_v5  ;;  %p251_p0 = scmp.ne.s32.totalorder %s337_s2, %s250_s17  ;;  %p254_p1 = scmp.lt.u32.totalorder %s250_s17, %s337_s2 }
   0x6   :  { %53 = vperm.xlu1 %249, %v23_v3   ;;  %43 = vperm.xlu0 %248, %v21_v4   ;;  %v91_v12 = vmul.f32 %v15_v8, %v15_v8  ;;  %v92_v15 = vmul.f32 %v16_v13, %v16_v13  ;;  %v93_v16 = vmul.f32 %v17_v14, %v17_v14  ;;  %v18_v19 = vld [vmem:[%s335_s0 + $0x30] sm:$0xff]  ;;  %v19_v20 = vld [vmem:[%s335_s0 + $0x38] sm:$0xff] }
   0x7   :  { %v96_v17 = vadd.f32 %v90_v11, %v88_v9  ;;  %v94_v21 = vmul.f32 %v18_v19, %v18_v19  ;;  %v95_v22 = vmul.f32 %v19_v20, %v19_v20  ;;  %v79_v29 = vadd.f32 %v15_v8, %v13_v6  ;;  %p256_p2 = pnand %p254_p1, %p251_p0 }
   0x8   :  { %v99_v18 = vadd.f32 %v91_v12, %v89_v10  ;;  %v77_v30 = vadd.f32 %v76_v28, %v16_v13 }
   0x9   :  { %v97_v23 = vadd.f32 %v96_v17, %v92_v15  ;;  %v80_v31 = vadd.f32 %v79_v29, %v17_v14 }
   0xa   :  { %v100_v24 = vadd.f32 %v99_v18, %v93_v16  ;;  %v78_v32 = vadd.f32 %v77_v30, %v18_v19 }
   0xb   :  { %v98_v25 = vadd.f32 %v97_v23, %v94_v21  ;;  %v81_v33 = vadd.f32 %v80_v31, %v19_v20 }
   0xc   :  { %v101_v26 = vadd.f32 %v100_v24, %v95_v22  ;;  %v123_v34 = vrot.slane %v78_v32, 4 }
   0xd   :  { %v124_v35 = vrot.slane %v81_v33, 4 }
   0xe   :  { %v133_v27 = vadd.f32 %v101_v26, %v98_v25  ;;  %v127_v38 = vadd.f32 %v123_v34, %v78_v32 }
   0xf   :  { %v128_v39 = vadd.f32 %v124_v35, %v81_v33 }
  0x10   :  { %v186_v41 = vsel %vm145_vm0, %v127_v38, 0.0 }
  0x11   :  { %v193_v42 = vsel %vm145_vm0, %v128_v39, 0.0  ;;  %v187_v52 = vrot.slane %v186_v41, 4 }
  0x12   :  { %v194_v53 = vrot.slane %v193_v42, 4 }
  0x13   :  { %v188_v60 = vadd.f32 %v187_v52, %v186_v41 }
  0x14   :  { %v195_v61 = vadd.f32 %v194_v53, %v193_v42 }
  0x15   :  { %v189_v2 = vrot.slane %v188_v60, 2 }
  0x16   :  { %v196_v3 = vrot.slane %v195_v61, 2 }
  0x17   :  { %v190_v12 = vadd.f32 %v189_v2, %v188_v60 }
  0x19   :  { %v191_v26 = vrot.slane %v190_v12, 1 }
  0x1b   :  { %v192_v32 = vadd.f32 %v191_v26, %v190_v12 }
  0x25   :  { %134 = vadd.xlane.f32.xlu0 %v133_v27 }
  0x81   :  { %v49_v36 = vpop.permute.xlu1 %48  ;;  %v39_v37 = vpop.permute.xlu0 %38 }
  0x82   :  { %v56_v43 = vmul.f32 %v39_v37, %v12_v5  ;;  %v57_v44 = vmul.f32 %v39_v37, %v13_v6  ;;  %v60_v48 = vmul.f32 %v49_v36, %v16_v13  ;;  %v61_v49 = vmul.f32 %v49_v36, %v17_v14 }
  0x83   :  { %v197_v13 = vadd.f32 %v196_v3, %v195_v61 }
  0x85   :  { %v44_v40 = vpop.permute.xlu0 %43  ;;  %v54_v47 = vpop.permute.xlu1 %53  ;;  %v198_v27 = vrot.slane %v197_v13, 1 }
  0x86   :  { %v58_v45 = vmul.f32 %v44_v40, %v14_v7  ;;  %v59_v46 = vmul.f32 %v44_v40, %v15_v8  ;;  %v62_v54 = vmul.f32 %v54_v47, %v18_v19  ;;  %v63_v55 = vmul.f32 %v54_v47, %v19_v20 }
  0x87   :  { %v199_v33 = vadd.f32 %v198_v27, %v197_v13 }
  0x88   :  { %v64_v50 = vadd.f32 %v58_v45, %v56_v43  ;;  %v67_v51 = vadd.f32 %v59_v46, %v57_v44 }
  0x8a   :  { %v65_v56 = vadd.f32 %v64_v50, %v60_v48  ;;  %v68_v57 = vadd.f32 %v67_v51, %v61_v49 }
  0x8c   :  { %v66_v58 = vadd.f32 %v65_v56, %v62_v54  ;;  %v69_v59 = vadd.f32 %v68_v57, %v63_v55 }
  0x8e   :  { %v115_v62 = vrot.slane %v66_v58, 4  ;;  %v116_v63 = vrot.slane %v69_v59, 4 }
  0x90   :  { %v119_v0 = vadd.f32 %v115_v62, %v66_v58  ;;  %v120_v1 = vadd.f32 %v116_v63, %v69_v59 }
  0x92   :  { %v129_v4 = vmul.f32 0.125, %v119_v0  ;;  %v130_v5 = vmul.f32 0.125, %v120_v1 }
  0x94   :  { %v158_v6 = vmul.f32 %v129_v4, %v127_v38  ;;  %v159_v7 = vmul.f32 %v130_v5, %v128_v39  ;;  %v143_v8 = vmul.f32 %v129_v4, %v129_v4  ;;  %v144_v9 = vmul.f32 %v130_v5, %v130_v5 }
  0x95   :  { %v172_v10 = vsel %vm145_vm0, %v129_v4, 0.0  ;;  %v179_v11 = vsel %vm145_vm0, %v130_v5, 0.0 }
  0x96   :  { %v160_v14 = vsel %vm145_vm0, %v158_v6, 0.0  ;;  %v161_v15 = vsel %vm145_vm0, %v159_v7, 0.0  ;;  %v146_v16 = vsel %vm145_vm0, %v143_v8, 0.0  ;;  %v147_v17 = vsel %vm145_vm0, %v144_v9, 0.0 }
  0x97   :  { %v162_v18 = vadd.f32 %v161_v15, %v160_v14  ;;  %v148_v19 = vadd.f32 %v147_v17, %v146_v16  ;;  %v173_v20 = vrot.slane %v172_v10, 4  ;;  %v180_v21 = vrot.slane %v179_v11, 4 }
  0x99   :  { %163 = vadd.xlane.f32.xlu0 %v162_v18  ;;  %149 = vadd.xlane.f32.xlu1 %v148_v19  ;;  %v174_v22 = vadd.f32 %v173_v20, %v172_v10  ;;  %v181_v23 = vadd.f32 %v180_v21, %v179_v11 }
  0x9b   :  { %v175_v24 = vrot.slane %v174_v22, 2  ;;  %v182_v25 = vrot.slane %v181_v23, 2 }
  0x9d   :  { %v176_v28 = vadd.f32 %v175_v24, %v174_v22  ;;  %v183_v29 = vadd.f32 %v182_v25, %v181_v23 }
  0x9f   :  { %v177_v30 = vrot.slane %v176_v28, 1  ;;  %v184_v31 = vrot.slane %v183_v29, 1 }
  0xa1   :  { %v178_v34 = vadd.f32 %v177_v30, %v176_v28  ;;  %v185_v35 = vadd.f32 %v184_v31, %v183_v29 }
  0xa3   :  { %v200_v36 = vmul.f32 %v192_v32, %v178_v34  ;;  %v201_v37 = vmul.f32 %v199_v33, %v185_v35 }
  0xa5   :  { %v203_v38 = vsel %vm202_vm1, %v200_v36, 0.0  ;;  %v204_v39 = vsel %vm202_vm1, %v201_v37, 0.0 }
  0xa6   :  { %v205_v40 = vadd.f32 %v204_v39, %v203_v38 }
  0xa8   :  { %206 = vadd.xlane.f32.xlu0 %v205_v40 }
  0xb2   :  { %v135_v41 = vpop.xlane.xlu0 %134 }
  0xb3   :  { %v136_v42 = vrot.slane %v135_v41, 4 }
  0xb5   :  { %v137_v43 = vadd.f32 %v136_v42, %v135_v41 }
  0xb7   :  { %v138_v44 = vrot.slane %v137_v43, 2 }
  0xb9   :  { %v139_v45 = vadd.f32 %v138_v44, %v137_v43 }
  0xbb   :  { %v140_v46 = vrot.slane %v139_v45, 1 }
  0xbd   :  { %v141_v47 = vadd.f32 %v140_v46, %v139_v45 }
  0xbf   :  { %238 = vpush %v141_v47 }
  0xf0   :  { %s239_s0 = spop %238 }
  0xf1   :  { %s215_s5 = smul.f32 2.0, %s239_s0 }
 0x126   :  { %v164_v48 = vpop.xlane.xlu0 %163  ;;  %v150_v49 = vpop.xlane.xlu1 %149 }
 0x127   :  { %v165_v50 = vrot.slane %v164_v48, 4  ;;  %v151_v51 = vrot.slane %v150_v49, 4 }
 0x129   :  { %v166_v52 = vadd.f32 %v165_v50, %v164_v48  ;;  %v152_v53 = vadd.f32 %v151_v51, %v150_v49 }
 0x12b   :  { %v167_v54 = vrot.slane %v166_v52, 2  ;;  %v153_v55 = vrot.slane %v152_v53, 2 }
 0x12d   :  { %v154_v56 = vadd.f32 %v153_v55, %v152_v53  ;;  %v168_v57 = vadd.f32 %v167_v54, %v166_v52 }
 0x12f   :  { %v155_v58 = vrot.slane %v154_v56, 1  ;;  %v169_v59 = vrot.slane %v168_v57, 1 }
 0x131   :  { %v156_v60 = vadd.f32 %v155_v58, %v154_v56  ;;  %v170_v61 = vadd.f32 %v169_v59, %v168_v57 }
 0x133   :  { %240 = vpush %v156_v60 }
 0x134   :  { %242 = vpush %v170_v61 }
 0x135   :  { %v207_v62 = vpop.xlane.xlu0 %206 }
 0x136   :  { %v208_v63 = vrot.slane %v207_v62, 4 }
 0x138   :  { %v209_v0 = vadd.f32 %v208_v63, %v207_v62 }
 0x13a   :  { %v210_v1 = vrot.slane %v209_v0, 2 }
 0x13c   :  { %v211_v2 = vadd.f32 %v210_v1, %v209_v0 }
 0x13e   :  { %v212_v3 = vrot.slane %v211_v2, 1 }
 0x140   :  { %v213_v4 = vadd.f32 %v212_v3, %v211_v2 }
 0x142   :  { %244 = vpush %v213_v4 }
 0x164   :  { %s241_s4 = spop %240 }
 0x165   :  { %s216_s6 = smul.f32 16.0, %s241_s4  ;;  %s243_s7 = spop %242 }
 0x166   :  { %s220_s11 = smul.f32 4.0, %s243_s7 }
 0x167   :  { %s217_s9 = sadd.f32 %s216_s6, %s215_s5 }
 0x173   :  { %s245_s8 = spop %244 }
 0x174   :  { %s218_s10 = smul.f32 2.0, %s245_s8 }
 0x176   :  { %s219_s12 = ssub.f32 %s217_s9, %s218_s10 }
 0x178   :  { %s221_s13 = sadd.f32 %s220_s11, %s219_s12 }
 0x17a   :  { %s222_s14 = smul.f32 0.0078125, %s221_s13 }
 0x17c   :  { %224 = sst [smem:[#allocation5]] %s222_s14 }
 0x17d   :  { %259 = shalt.err (!%p256_p2)
}
 0x17e   :  { %s263_s22 = smov [#allocation5]  }
 0x17f   :  { %232 = dma.smem_to_hbm %s263_s22, 16, %s337_s2, [#allocation6]  }
 0x180   :  { %260 = dma.done.wait [#allocation6], 16  }
 0x181   :  { %261 = vsyncadd [#allocation6], 4294967280 }
 0x182   :  { %236 = sfence }
 0x183   :  { %237 = vsyncpa [#allocation6], 1 }

</bundles_post_ra>
